<compile_context>
chip_gen: v7x
topology: tpu7x:2x2x1
jax: 0.10.0
libtpu: 0.0.40
codegen_flags: <defaults>
</compile_context>

<pallas_src>
import functools

import jax
import jax.numpy as jnp
from jax.experimental import pallas as pl
from jax.experimental.pallas import tpu as pltpu

NUM_JOINTS = 15
LATENT_DIM = 128
INPUT_DIM = (NUM_JOINTS + 1) * 6 + 3          # 99
POSE_DIM = INPUT_DIM - 3                       # 96
POSE_LATENT_DIM = (NUM_JOINTS + 1) * 3         # 48
MULTI_IN = (POSE_LATENT_DIM + 3) * 2           # 102
FEAT = 2 * INPUT_DIM                           # 198


def _make_kernel(compute_dtype):
    def _fused_kernel(x_ref, wf_ref, bf_ref, out_ref):
        x = x_ref[...]
        if compute_dtype != jnp.float32:
            # In-kernel cast: zero extra HBM traffic, full-rate bf16 MXU.
            x = x.astype(compute_dtype)
        out_ref[...] = (
            jnp.dot(x, wf_ref[...], preferred_element_type=jnp.float32)
            + bf_ref[...]
        ).astype(out_ref.dtype)
    return _fused_kernel


def init_params(key):
    """Deterministic synthetic parameters. Weights are (in_features, out_features)."""
    ks = jax.random.split(key, 6)
    s = 0.05
    return dict(
        wt=s * jax.random.normal(ks[0], (3, 3), jnp.float32),
        bt=s * jax.random.normal(ks[1], (3,), jnp.float32),
        wp=s * jax.random.normal(ks[2], (POSE_DIM, POSE_LATENT_DIM), jnp.float32),
        bp=s * jax.random.normal(ks[3], (POSE_LATENT_DIM,), jnp.float32),
        wm=s * jax.random.normal(ks[4], (MULTI_IN, LATENT_DIM), jnp.float32),
        bm=s * jax.random.normal(ks[5], (LATENT_DIM,), jnp.float32),
    )


def _fuse_params(params, compute_dtype=jnp.float32):
    """Fold transEmbedding / poseEmbedding / multiHandEmbedding into one affine map."""
    wt, bt = params["wt"], params["bt"]
    wp, bp = params["wp"], params["bp"]
    wm, bm = params["wm"], params["bm"]

    wm_t1 = wm[0:3]
    wm_p1 = wm[3:3 + POSE_LATENT_DIM]
    wm_t2 = wm[3 + POSE_LATENT_DIM:6 + POSE_LATENT_DIM]
    wm_p2 = wm[6 + POSE_LATENT_DIM:]

    w_fused = jnp.concatenate(
        [wt @ wm_t1, wp @ wm_p1, wt @ wm_t2, wp @ wm_p2], axis=0)       # (198, 128)
    b_fused = (bt @ wm_t1 + bp @ wm_p1 + bt @ wm_t2 + bp @ wm_p2 + bm)  # (128,)
    return (w_fused.astype(compute_dtype),
            b_fused.reshape(1, LATENT_DIM).astype(jnp.float32))


def _round_up(v, a):
    return ((v + a - 1) // a) * a


def input_process_handpose(x, params, *, tile_s=2048,
                           compute_dtype=jnp.float32, out_dtype=jnp.float32):
    """Forward pass of InputProcess_HandPose. Returns (seqlen, bs, LATENT_DIM).

    compute_dtype=jnp.bfloat16 casts the x tile inside the kernel (f32 accumulation)
    for extra MXU/bandwidth headroom; out_dtype=jnp.bfloat16 halves write traffic if
    the consumer accepts it. Defaults (f32/f32) match the reference up to matmul
    reassociation rounding.
    """
    if x.ndim == 4:
        bs, seqlen = x.shape[:2]
        x = x.reshape(bs, seqlen, -1)            # free reshape
    bs, seqlen, inp_dim = x.shape
    assert inp_dim == FEAT, (
        f"Input dimension mismatch. Expected {FEAT}, got {inp_dim}")

    w_fused, b_fused = _fuse_params(params, compute_dtype)

    # Clamp the seq tile to the (8-aligned) sequence length; Pallas masks the
    # partial last block, so no jnp.pad / extra HBM copy is needed.
    tile_s = max(8, min(_round_up(tile_s, 8), _round_up(seqlen, 8)))
    grid = (bs, pl.cdiv(seqlen, tile_s))

    kernel = _make_kernel(compute_dtype)

    out = pl.pallas_call(
        kernel,
        # Output laid out as (seqlen, bs*128): the module's permute(1,0,2) is
        # realized by the output index_map, not a post-kernel transpose pass.
        out_shape=jax.ShapeDtypeStruct((seqlen, bs * LATENT_DIM), out_dtype),
        grid=grid,
        in_specs=[
            # (bs, seqlen, 198) -> kernel sees a (tile_s, 198) slab of batch b.
            pl.BlockSpec((None, tile_s, FEAT), lambda b, s: (b, s, 0)),
            # Fused weight / bias: constant block index -> VMEM-resident.
            pl.BlockSpec((FEAT, LATENT_DIM), lambda b, s: (0, 0)),
            pl.BlockSpec((1, LATENT_DIM), lambda b, s: (0, 0)),
        ],
        out_specs=pl.BlockSpec((tile_s, LATENT_DIM), lambda b, s: (s, b)),
        compiler_params=pltpu.CompilerParams(
            dimension_semantics=("parallel", "parallel")),
    )(x, w_fused, b_fused)

    # Free row-major reshape: (seqlen, bs*128) -> (seqlen, bs, 128).
    return out.reshape(seqlen, bs, LATENT_DIM)


def _reference(x, params):
    """Pure-JAX reference matching the PyTorch forward exactly."""
    if x.ndim == 4:
        bs, seqlen = x.shape[:2]
        x = x.reshape(bs, seqlen, -1)
    xt = jnp.transpose(x, (1, 0, 2))
    xh1, xh2 = xt[..., :INPUT_DIM], xt[..., INPUT_DIM:]
    te1 = xh1[..., :3] @ params["wt"] + params["bt"]
    pe1 = xh1[..., 3:] @ params["wp"] + params["bp"]
    te2 = xh2[..., :3] @ params["wt"] + params["bt"]
    pe2 = xh2[..., 3:] @ params["wp"] + params["bp"]
    cat = jnp.concatenate([te1, pe1, te2, pe2], axis=-1)
    return cat @ params["wm"] + params["bm"]


if __name__ == "__main__":
    key = jax.random.PRNGKey(0)
    kx, kp, kx2, kx3 = jax.random.split(key, 4)
    params = init_params(kp)

    # Small shape consistent with the module (3-D input path).
    bs, seqlen = 2, 8
    x = jax.random.normal(kx, (bs, seqlen, FEAT), jnp.float32)
    out = jax.block_until_ready(input_process_handpose(x, params))
    ref = _reference(x, params)
    assert out.shape == (seqlen, bs, LATENT_DIM), out.shape
    assert jnp.allclose(out, ref, atol=1e-4, rtol=1e-4), float(jnp.abs(out - ref).max())

    # Multi-tile grid + non-divisible seqlen (partial last block, no padding copy).
    bs2, seqlen2 = 3, 43
    x2 = jax.random.normal(kx2, (bs2, seqlen2, FEAT), jnp.float32)
    out2 = jax.block_until_ready(input_process_handpose(x2, params, tile_s=16))
    ref2 = _reference(x2, params)
    assert out2.shape == (seqlen2, bs2, LATENT_DIM), out2.shape
    assert jnp.allclose(out2, ref2, atol=1e-4, rtol=1e-4), float(jnp.abs(out2 - ref2).max())

    # 4-D input path (view/flatten on the last two dims, as in the PyTorch module).
    x4 = jax.random.normal(kx3, (2, 8, 2, INPUT_DIM), jnp.float32)
    out4 = jax.block_until_ready(input_process_handpose(x4, params))
    ref4 = _reference(x4, params)
    assert out4.shape == (8, 2, LATENT_DIM), out4.shape
    assert jnp.allclose(out4, ref4, atol=1e-4, rtol=1e-4), float(jnp.abs(out4 - ref4).max())

    # bf16 compute path (in-kernel cast, f32 accumulation) — loose tolerance.
    out_bf = jax.block_until_ready(
        input_process_handpose(x2, params, tile_s=16, compute_dtype=jnp.bfloat16))
    assert out_bf.shape == (seqlen2, bs2, LATENT_DIM), out_bf.shape
    assert jnp.allclose(out_bf, ref2, atol=5e-2, rtol=5e-2), \
        float(jnp.abs(out_bf - ref2).max())

    print("KERNEL_OK")
</pallas_src>

<mosaic_0001>
module attributes {stable_mosaic.version = 11 : i64} {
  func.func @_fused_kernel(%arg0: i32, %arg1: i32, %arg2: memref<1x8x198xf32, #tpu.memory_space<vmem>>, %arg3: memref<198x128xf32, #tpu.memory_space<vmem>>, %arg4: memref<1x128xf32, #tpu.memory_space<vmem>>, %arg5: memref<8x128xf32, #tpu.memory_space<vmem>>) attributes {dimension_semantics = [#tpu.dimension_semantics<parallel>, #tpu.dimension_semantics<parallel>], iteration_bounds = array<i64: 2, 1>, scalar_prefetch = 0 : i64, scratch_operands = 0 : i64, tpu.core_type = #tpu.core_type<tc>, window_params = [{transform_indices = @transform_0, window_bounds = array<i64: 1, 8, 198>}, {pipeline_mode = #tpu.pipeline_mode<synchronous>, transform_indices = @transform_1, window_bounds = array<i64: 198, 128>}, {pipeline_mode = #tpu.pipeline_mode<synchronous>, transform_indices = @transform_2, window_bounds = array<i64: 1, 128>}, {transform_indices = @transform_3, window_bounds = array<i64: 8, 128>}]} {
    %c0 = arith.constant 0 : index
    %c0_0 = arith.constant 0 : index
    %c0_1 = arith.constant 0 : index
    %0 = vector.load %arg2[%c0, %c0_0, %c0_1] : memref<1x8x198xf32, #tpu.memory_space<vmem>>, vector<1x8x198xf32>
    %1 = vector.shape_cast %0 : vector<1x8x198xf32> to vector<8x198xf32>
    %c0_2 = arith.constant 0 : index
    %c0_3 = arith.constant 0 : index
    %2 = vector.load %arg3[%c0_2, %c0_3] : memref<198x128xf32, #tpu.memory_space<vmem>>, vector<198x128xf32>
    %cst = arith.constant dense<0.000000e+00> : vector<8x128xf32>
    %3 = tpu.matmul %1, %2, %cst {dimension_numbers = #tpu.dot_dimension_numbers<[1], [0], [0], [1], [0, 0, 1, 1], [], []>} : vector<8x198xf32>, vector<198x128xf32>, vector<8x128xf32> -> vector<8x128xf32>
    %c0_4 = arith.constant 0 : index
    %c0_5 = arith.constant 0 : index
    %4 = vector.load %arg4[%c0_4, %c0_5] : memref<1x128xf32, #tpu.memory_space<vmem>>, vector<1x128xf32>
    %5 = vector.broadcast %4 : vector<1x128xf32> to vector<8x128xf32>
    %6 = arith.addf %3, %5 : vector<8x128xf32>
    %c0_6 = arith.constant 0 : index
    %c0_7 = arith.constant 0 : index
    %7 = vector.load %arg5[%c0_6, %c0_7] : memref<8x128xf32, #tpu.memory_space<vmem>>, vector<8x128xf32>
    tpu.vector_store %arg5[%c0_6, %c0_7], %6 {strides = array<i32>} : memref<8x128xf32, #tpu.memory_space<vmem>>, vector<8x128xf32>,
    return
  }
  func.func @transform_0(%arg0: i32, %arg1: i32) -> (i32, i32, i32) {
    %c0_i32 = arith.constant 0 : i32
    %c0_i32_0 = arith.constant 0 : i32
    return %arg0, %arg1, %c0_i32 : i32, i32, i32
  }
  func.func @transform_1(%arg0: i32, %arg1: i32) -> (i32, i32) {
    %c0_i32 = arith.constant 0 : i32
    %c0_i32_0 = arith.constant 0 : i32
    %c0_i32_1 = arith.constant 0 : i32
    return %c0_i32, %c0_i32_0 : i32, i32
  }
  func.func @transform_2(%arg0: i32, %arg1: i32) -> (i32, i32) {
    %c0_i32 = arith.constant 0 : i32
    %c0_i32_0 = arith.constant 0 : i32
    %c0_i32_1 = arith.constant 0 : i32
    return %c0_i32, %c0_i32_0 : i32, i32
  }
  func.func @transform_3(%arg0: i32, %arg1: i32) -> (i32, i32) {
    %c0_i32 = arith.constant 0 : i32
    return %arg1, %arg0 : i32, i32
  }
}

</mosaic_0001>

<bundles_post_ra>
// kernel: tpu_custom_call.1
= control target key start
LH: loop header
LB: loop body
LE: loop exit
PB: predicated region body
PF: predicated region fallthrough
CT: control target
= control target key end

     0   :  { %8 = vsyncpa [#allocation3], 0  ;;  %s970_s0 = inlined_call_operand.hbm [shape: f32[2,8,198], index: 0, kind: input, shape index: {}]   ;;  %s971_s1 = inlined_call_operand.hbm [shape: f32[198,128], index: 1, kind: input, shape index: {}]   ;;  %s972_s2 = inlined_call_operand.vmem [shape: f32[1,128], index: 2, kind: input, shape index: {}]   ;;  %s973_s3 = inlined_call_operand.hbm [shape: f32[8,256], index: 3, kind: output, shape index: {}]  }
   0x1   :  { %10 = vsyncpa [#allocation3 + $0x1], 0 }
   0x2   :  { %11 = vsyncpa [#allocation6], 0 }
   0x3   :  { %12 = vsyncpa [#allocation4], 0 }
   0x4   :  { %14 = vsyncpa [#allocation4 + $0x1], 0  ;;  %s748_s12 = smov 0   ;;  %s750_s13 = smov 0  }
   0x5   :  { %s752_s14 = smov 0   ;;  %s754_s15 = smov 0  }
   0x6   :  { %s756_s16 = smov 0   ;;  %s758_s17 = smov 0  }
   0x7 LB: > { %s442_s18 = sadd.s32 4294967295, %s719_s17   ;;  %s443_s19 = sadd.s32 4294967294, %s719_s17   ;;  %s719_s17 = sphi %s758_s17, %s20_s17   ;;  %s715_s16 = sphi %s756_s16, %s997_s16   ;;  %s711_s15 = sphi %s754_s15, %s996_s15   ;;  %s707_s14 = sphi %s752_s14, %s995_s14   ;;  %s703_s13 = sphi %s750_s13, %s994_s13   ;;  %s699_s12 = sphi %s748_s12, %s993_s12  }
   0x8   : > { %p54_p0 = scmp.ne.s32.totalorder %s703_s13, %s699_s12  ;;  %p782_p1 = scmp.eq.s32.totalorder %s442_s18, 0 }
   0x9   : > { %p786_p2 = scmp.eq.s32.totalorder %s442_s18, 1  ;;  %p128_p3 = scmp.eq.s32.totalorder %s443_s19, 1 }
   0xa   : > { %s978_s20 = scalar_select %p782_p1, 1, 0 }
   0xb   : > { %s979_s21 = scalar_select %p786_p2, 1, 0 }
   0xc   : > { %p792_p4 = por %p782_p1, %p54_p0  ;;  %p444_p5 = scmp.ge.s32.totalorder %s719_s17, 1 }
   0xd   : > { %p797_p6 = por %p128_p3, %p54_p0  ;;  %p135_p7 = scmp.lt.s32.totalorder %s719_s17, 3 }
   0xe   : > { %s980_s22 = scalar_select %p792_p4, 1, 0 }
   0xf   : > { %s981_s23 = scalar_select %p797_p6, 1, 0 }
  0x10   : > { %p802_p8 = pnand %p444_p5, %p135_p7  ;;  %s721_s25 = smov [#allocation5]  }
  0x11   : > { %s147_s26 = sshll.u32 %s721_s25, 4  ;;  %s32_s28 = sadd.s32 1, %s715_s16  ;;  %s148_s26 = int_to_ptr.vmem [resolvable:$true] %s147_s26 }
  0x12   : > { %s982_s24 = scalar_select %p802_p8, 1, 0 }
  0x13   : > { %p506_p9 = pneg %p802_p8  ;;  %s575_s4 = scalar_lea.hbm %s971_s1, 3200 }
  0x14   : > { %p576_p12 = scmp.ne.s32.totalorder %s971_s1, %s575_s4  ;;  %p582_p5 = scmp.lt.u32.totalorder %s575_s4, %s971_s1 }
  0x15   : > { %p811_p11 = pnand %p506_p9, %p782_p1 }
  0x17   : > { %p577_p13 = pneg %p811_p11 }
  0x19   : > { %p578_p0 = pnand %p577_p13, %p576_p12 }
  0x1b   : > { %p579_p3 = pneg %p578_p0 }
  0x1d   : > { %p584_p7 = pnand %p582_p5, %p579_p3 }
  0x1f   : > { %587 = shalt.err (!%p584_p7)
}
  0x20   : > { %s588_s9 = scalar_lea.vmem %s148_s26, 3200  ;;  %p596_p1 = scmp.lt.s32.totalorder %s148_s26, %s148_s26 }
  0x21   : > { %p589_p9 = scmp.ne.s32.totalorder %s148_s26, %s588_s9  ;;  %p597_p4 = scmp.lt.s32.totalorder %s588_s9, %s588_s9 }
  0x23   : > { %p591_p10 = pnand %p589_p9, %p577_p13  ;;  %p598_p8 = por %p597_p4, %p596_p1 }
  0x25   : > { %p592_p6 = pneg %p591_p10 }
  0x27   : > { %p599_p2 = pnand %p598_p8, %p592_p6 }
  0x29   : > { %602 = shalt.err (!%p599_p2)
}
  0x2a   : > { %s722_s10 = smov 128   ;;  %s723_s11 = smov 8  }
  0x2b   : > { %509 = dma.hbm_to_vmem [thread:$0]  (!%p811_p11), %s971_s1, 3200, %s148_s26, [#allocation6], %s722_s10, %s722_s10, %s723_s11  }
  0x2c   : > { %p34_p1 = scmp.ge.s32.totalorder %s32_s28, 2  ;;  %s41_s25 = sadd.s32 1, %s707_s14 }
  0x2d   : > { %p48_p2 = scmp.ne.s32.totalorder %s707_s14, %s703_s13  ;;  %p49_p4 = scmp.eq.s32.totalorder %s719_s17, 0 }
  0x2e   : > { %s999_s28 = smov (%p34_p1, %s32_s28), 0  ;;  %p985_p8 = scmp.ne.s32.totalorder %s979_s21, 0 }
  0x2f   : > { %p838_p6 = por %p49_p4, %p48_p2  ;;  %s36_s27 = ssub.s32 %s715_s16, %s999_s28 }
  0x30   : > { %p844_p10 = por %p985_p8, %p48_p2  ;;  %p519_p12 = scmp.lt.s32.totalorder %s719_s17, 2 }
  0x31   : > { %p39_p11 = scmp.eq.s32.totalorder %s36_s27, 0  ;;  %s164_s26 = sand.u32 1, %s707_s14  }
  0x32   : > { %s447_s4 = sshll.u32 %s164_s26, 4  ;;  %s461_s6 = sshll.u32 %s715_s16, 8 }
  0x33   : > { %s853_s5 = scalar_select %p39_p11, %s707_s14, %s41_s25  }
  0x34   : > { %s859_s9 = scalar_lea.hbm %s970_s0, %s461_s6  ;;  %s168_s21 = scalar_lea.vmem [#allocation2], %s447_s4 }
  0x35   : > { %s178_s10 = sshll.u32 %s168_s21, 4  ;;  %p865_p13 = pnand %p519_p12, %p838_p6  ;;  %s861_s10 = int_to_ptr.vmem [resolvable:$true] %s178_s10 }
  0x36   : > { %s165_s18 = scalar_lea.sflag [#allocation3], %s164_s26  ;;  %s603_s19 = scalar_lea.hbm %s859_s9, 256 }
  0x37   : > { %p604_p0 = scmp.ne.s32.totalorder %s859_s9, %s603_s19  ;;  %p605_p3 = pneg %p865_p13 }
  0x38   : > { %s608_s4 = scalar_lea.hbm %s970_s0, 512  ;;  %p609_p9 = scmp.lt.u32.totalorder %s859_s9, %s970_s0 }
  0x39   : > { %p606_p5 = pnand %p605_p3, %p604_p0  ;;  %p610_p1 = scmp.lt.u32.totalorder %s608_s4, %s603_s19 }
  0x3a   : > { %p612_p4 = scmp.lt.u32.totalorder %s603_s19, %s859_s9 }
  0x3b   : > { %p607_p7 = pneg %p606_p5  ;;  %p611_p2 = por %p610_p1, %p609_p9 }
  0x3d   : > { %p613_p6 = por %p612_p4, %p611_p2 }
  0x3f   : > { %p614_p8 = pnand %p613_p6, %p607_p7 }
  0x41   : > { %617 = shalt.err (!%p614_p8)
}
  0x42   : > { %s618_s26 = scalar_lea.vmem %s861_s10, 256  ;;  %s724_s7 = smov [#allocation2]  }
  0x43   : > { %p619_p12 = scmp.ne.s32.totalorder %s861_s10, %s618_s26  ;;  %s623_s8 = sshll.u32 %s724_s7, 4  ;;  %s624_s8 = int_to_ptr.vmem [resolvable:$false] %s623_s8 }
  0x44   : > { %s625_s21 = scalar_lea.vmem %s624_s8, 512  ;;  %p626_p5 = scmp.lt.s32.totalorder %s861_s10, %s624_s8 }
  0x45   : > { %p621_p11 = pnand %p619_p12, %p605_p3  ;;  %p627_p9 = scmp.lt.s32.totalorder %s625_s21, %s618_s26 }
  0x47   : > { %p622_p0 = pneg %p621_p11  ;;  %p628_p1 = por %p627_p9, %p626_p5 }
  0x49   : > { %p629_p2 = pnand %p628_p1, %p622_p0 }
  0x4b   : > { %632 = shalt.err (!%p629_p2)
}
  0x4c   : > { %513 = dma.hbm_to_vmem [thread:$0]  (!%p865_p13), %s859_s9, 256, %s861_s10, %s165_s18  }
  0x4d   : > { %p988_p7 = scmp.ne.s32.totalorder %s982_s24, 0 }
  0x4e   : > { %s897_s19 = sand.u32 (!%p988_p7), 1, %s703_s13   ;;  %p989_p3 = scmp.ne.s32.totalorder (!%p988_p7), %s980_s22, 0 }
  0x4f   : > { %187 = sbr.rel (%p988_p7) target bundleno = 370 (0x172), region = 32  ;;  %s451_s25 = sshll.u32 (!%p988_p7), %s897_s19, 4 }
  0x50   : > { %s190_s27 = scalar_lea.sflag (!%p988_p7), [#allocation3], %s897_s19  ;;  %s901_s4 = scalar_lea.vmem (!%p988_p7), [#allocation2], %s451_s25 }
  0x56   : > { %686 = dma.done.wait (%p989_p3), %s190_s27, 256  }
  0x57   : > { %688 = vsyncadd (%p989_p3), %s190_s27, 4294967040  ;;  %p990_p13 = scmp.ne.s32.totalorder %s978_s20, 0 }
  0x59   : > { %690 = dma.done.wait (%p990_p13), [#allocation6], 3200  }
  0x5a   : > { %692 = vsyncadd (%p990_p13), [#allocation6], 4294964096  ;;  %v725_v0 = vmov 0.0|0.0   ;;  %v222_v1 = vld [vmem:[#allocation5] sm:$0xff]  ;;  %v223_v2 = vld [vmem:[#allocation5 + $0x8] sm:$0xff]  ;;  %vm254_vm0 = vcmask 572416  }
  0x5b   : > { %462 = vmatprep.subr.bf16.mxu0 %v725_v0  ;;  %v224_v3 = vld [vmem:[#allocation5 + $0x10] sm:$0xff]  ;;  %v463_v4 = vpack.c.bf16 %v223_v2, %v222_v1  ;;  %v225_v5 = vld [vmem:[#allocation5 + $0x18] sm:$0xff]  ;;  %v226_v7 = vld [vmem:[#allocation5 + $0x20] sm:$0xff]  ;;  %v726_v38 = vmov 0.0   ;;  %vm258_vm1 = vcmask 1045504   ;;  %s453_s20 = sshll.u32 %s897_s19, 3 }
  0x5c   : > { %v466_v6 = vpack.c.bf16 %v225_v5, %v224_v3  ;;  %v227_v8 = vld [vmem:[#allocation5 + $0x28] sm:$0xff]  ;;  %v228_v10 = vld [vmem:[#allocation5 + $0x30] sm:$0xff]  ;;  %v229_v11 = vld [vmem:[#allocation5 + $0x38] sm:$0xff]  ;;  %s458_s9 = sshll.u32 %s711_s15, 7  ;;  %s219_s10 = scalar_lea.vmem [#allocation7], %s453_s20 }
  0x5d   : > { %464 = vmatpush1.bf16.msra.mxu0 %v463_v4  ;;  %v469_v9 = vpack.c.bf16 %v227_v8, %v226_v7  ;;  %v221_v12 = vld [vmem:[%s901_s4 + $0x8] sm:$0xff]  ;;  %v472_v13 = vpack.c.bf16 %v229_v11, %v228_v10  ;;  %v230_v14 = vld [vmem:[#allocation5 + $0x40] sm:$0xff]  ;;  %v232_v17 = vld [vmem:[#allocation5 + $0x50] sm:$0xff]  ;;  %s349_s11 = sshll.u32 %s219_s10, 4  ;;  %s921_s6 = scalar_lea.hbm %s973_s3, %s458_s9  ;;  %s923_s11 = int_to_ptr.vmem [resolvable:$true] %s349_s11 }
  0x5e   : > { %465 = vmatprep.subr.bf16.mxu0 %v725_v0  ;;  %456 = vmatprep.mubr.msk.f32.mxu0 %vm254_vm0, %v221_v12  ;;  %v231_v15 = vld [vmem:[#allocation5 + $0x48] sm:$0xff]  ;;  %v233_v18 = vld [vmem:[#allocation5 + $0x58] sm:$0xff]  ;;  %v234_v20 = vld [vmem:[#allocation5 + $0x60] sm:$0xff]  ;;  %s334_s26 = scalar_lea.sflag [#allocation4], %s897_s19  ;;  %s633_s7 = scalar_lea.vmem %s923_s11, 128 }
  0x5f   : > { %v475_v16 = vpack.c.bf16 %v231_v15, %v230_v14  ;;  %v478_v19 = vpack.c.bf16 %v233_v18, %v232_v17  ;;  %v235_v21 = vld [vmem:[#allocation5 + $0x68] sm:$0xff]  ;;  %v236_v23 = vld [vmem:[#allocation5 + $0x70] sm:$0xff]  ;;  %v237_v24 = vld [vmem:[#allocation5 + $0x78] sm:$0xff]  ;;  %p634_p4 = scmp.ne.s32.totalorder %s923_s11, %s633_s7  ;;  %s727_s15 = smov [#allocation7]  }
  0x60   : > { %v481_v22 = vpack.c.bf16 %v235_v21, %v234_v20  ;;  %v484_v25 = vpack.c.bf16 %v237_v24, %v236_v23  ;;  %v238_v26 = vld [vmem:[#allocation5 + $0x80] sm:$0xff]  ;;  %v239_v27 = vld [vmem:[#allocation5 + $0x88] sm:$0xff]  ;;  %v240_v29 = vld [vmem:[#allocation5 + $0x90] sm:$0xff]  ;;  %s637_s8 = sshll.u32 %s727_s15, 4  ;;  %s638_s8 = int_to_ptr.vmem [resolvable:$false] %s637_s8 }
  0x61   : > { %467 = vmatpush1.bf16.msra.mxu0 %v466_v6  ;;  %v487_v28 = vpack.c.bf16 %v239_v27, %v238_v26  ;;  %v241_v30 = vld [vmem:[#allocation5 + $0x98] sm:$0xff]  ;;  %v242_v32 = vld [vmem:[#allocation5 + $0xa0] sm:$0xff]  ;;  %v243_v33 = vld [vmem:[#allocation5 + $0xa8] sm:$0xff]  ;;  %p635_p6 = pnand %p634_p4, %p844_p10  ;;  %s639_s21 = scalar_lea.vmem %s638_s8, 256 }
  0x62   : > { %468 = vmatprep.subr.bf16.mxu0 %v725_v0  ;;  %v490_v31 = vpack.c.bf16 %v241_v30, %v240_v29  ;;  %v493_v34 = vpack.c.bf16 %v243_v33, %v242_v32  ;;  %v244_v35 = vld [vmem:[#allocation5 + $0xb0] sm:$0xff]  ;;  %v245_v36 = vld [vmem:[#allocation5 + $0xb8] sm:$0xff]  ;;  %v246_v39 = vld [vmem:[#allocation5 + $0xc0] sm:$0x3f]  ;;  %p640_p12 = scmp.lt.s32.totalorder %s923_s11, %s638_s8  ;;  %p641_p11 = scmp.lt.s32.totalorder %s639_s21, %s633_s7 }
  0x63   : > { %v496_v37 = vpack.c.bf16 %v245_v36, %v244_v35  ;;  %v220_v40 = vld [vmem:[%s901_s4] sm:$0xff]  ;;  %p636_p8 = pneg %p635_p6 }
  0x64   : > { %v454_v41 = vld [vmem:[%s972_s2] ss:$0 sm:$0xff]  ;;  %p642_p0 = por %p641_p11, %p640_p12 }
  0x65   : > { %470 = vmatpush1.bf16.msra.mxu0 %v469_v9 }
  0x66   : > { %471 = vmatprep.subr.bf16.mxu0 %v725_v0  ;;  %p643_p5 = pnand %p642_p0, %p636_p8 }
  0x69   : > { %473 = vmatpush1.bf16.msra.mxu0 %v472_v13 }
  0x6a   : > { %474 = vmatprep.subr.bf16.mxu0 %v725_v0 }
  0x6d   : > { %476 = vmatpush1.bf16.msra.mxu0 %v475_v16 }
  0x6e   : > { %477 = vmatprep.subr.bf16.mxu0 %v725_v0 }
  0x71   : > { %479 = vmatpush1.bf16.msra.mxu0 %v478_v19 }
  0x72   : > { %480 = vmatprep.subr.bf16.mxu0 %v725_v0 }
  0x75   : > { %482 = vmatpush1.bf16.msra.mxu0 %v481_v22 }
  0x76   : > { %483 = vmatprep.subr.bf16.mxu0 %v725_v0 }
  0x79   : > { %485 = vmatpush1.bf16.msra.mxu0 %v484_v25 }
  0x7a   : > { %486 = vmatprep.subr.bf16.mxu0 %v725_v0 }
  0x7d   : > { %488 = vmatpush1.bf16.msra.mxu0 %v487_v28 }
  0x7e   : > { %489 = vmatprep.subr.bf16.mxu0 %v725_v0 }
  0x81   : > { %491 = vmatpush1.bf16.msra.mxu0 %v490_v31 }
  0x82   : > { %492 = vmatprep.subr.bf16.mxu0 %v725_v0 }
  0x85   : > { %494 = vmatpush1.bf16.msra.mxu0 %v493_v34 }
  0x86   : > { %495 = vmatprep.subr.bf16.mxu0 %v725_v0 }
  0x89   : > { %497 = vmatpush1.bf16.msra.mxu0 %v496_v37 }
  0x8a   : > { %310 = vmatprep.subr.mxu0 %v726_v38 }
  0x8d   : > { %455 = vmatpush1.msk.msra.mxu0 %vm258_vm1, %v246_v39 }
  0x8e   : > { %327 = vmatmul.mubr.f32.vlgmr.msra.gmra.mrb[0].mxu0 %v220_v40 }
 0x161   : > { %v328_v42 = vpop.f32.mrb[0].mxu0 }
 0x162   : > { %v329_v43 = vadd.f32 %v454_v41, %v328_v42  ;;  %v330_v44 = vpop.f32.mrb[1].mxu0 }
 0x164   : > { %332 = vst [vmem:[%s219_s10] sm:$0xff] %v329_v43 }
 0x165   : > { %646 = shalt.err (!%p643_p5)
}
 0x166   : > { %s647_s19 = scalar_lea.hbm %s921_s6, 128  ;;  %s651_s4 = scalar_lea.hbm %s973_s3, 256 }
 0x167   : > { %p648_p9 = scmp.ne.s32.totalorder %s921_s6, %s647_s19  ;;  %p652_p7 = scmp.lt.u32.totalorder %s921_s6, %s973_s3 }
 0x168   : > { %p653_p3 = scmp.lt.u32.totalorder %s651_s4, %s647_s19  ;;  %p655_p4 = scmp.lt.u32.totalorder %s647_s19, %s921_s6 }
 0x169   : > { %p649_p1 = pnand %p648_p9, %p844_p10 }
 0x16a   : > { %p654_p13 = por %p653_p3, %p652_p7 }
 0x16b   : > { %p650_p2 = pneg %p649_p1 }
 0x16c   : > { %p656_p6 = por %p655_p4, %p654_p13 }
 0x16e   : > { %p657_p8 = pnand %p656_p6, %p650_p2 }
 0x170   : > { %660 = shalt.err (!%p657_p8)
}
 0x171   : > { %504 = dma.vmem_to_hbm [thread:$0]  (%p844_p10), %s923_s11, 128, %s921_s6, %s334_s26  }
 0x172 PF: > { %s361_s24 = sand.u32 1, %s699_s12   ;;  %p991_p12 = scmp.ne.s32.totalorder %s981_s23, 0 }
 0x173   : > { %p992_p11 = scmp.ge.s32.totalorder %s719_s17, 2  ;;  %s362_s9 = scalar_lea.sflag [#allocation4], %s361_s24 }
 0x175   : > { %p515_p0 = pnand %p992_p11, %p991_p12 }
 0x177   : > { %694 = dma.done.wait (!%p515_p0), %s362_s9, 128  }
 0x178   : > { %696 = vsyncadd (!%p515_p0), %s362_s9, 4294967168  ;;  %s20_s17 = sadd.s32 1, %s719_s17   ;;  %s993_s12 = smov %s703_s13 }
 0x179   : > { %p17_p5 = scmp.ge.s32.totalorder %s20_s17, 4   ;;  %s994_s13 = smov %s707_s14 }
 0x17a   : > { %s995_s14 = smov %s853_s5  ;;  %s996_s15 = smov %s715_s16 }
 0x17b   : > { %s997_s16 = smov %s999_s28  ;;  %19 = sbr.rel (!%p17_p5) target bundleno = 7 (0x7), region = 81 }
 0x182   :  { %367 = vsyncpa [#allocation3], 1 }
 0x183   :  { %369 = vsyncpa [#allocation3 + $0x1], 1 }
 0x184   :  { %370 = vsyncpa [#allocation6], 1 }
 0x185   :  { %371 = vsyncpa [#allocation4], 1 }
 0x186   :  { %373 = vsyncpa [#allocation4 + $0x1], 1 }

</bundles_post_ra>
